<compile_context>
chip_gen: v5e
topology: v5e:2x2
jax: 0.10.0
libtpu: 0.0.40
codegen_flags: <defaults>
</compile_context>

<pallas_src>
import jax
import jax.numpy as jnp
from jax import lax
from jax.experimental import pallas as pl
from jax.experimental.pallas import tpu as pltpu


def _round_up(x, m):
    return ((x + m - 1) // m) * m


def mlp_2nd_order_kernel(z_ref, w1_ref, b1_ref, w2_ref, b2_ref, w3_ref, b3_ref,
                         o_ref):
    # z_ref : (bm, d_in)   packed [first_order_input | x_input | t]
    # w1_ref: (d_in, H)    b1_ref: (1, H)
    # w2_ref: (H, H)       b2_ref: (1, H)
    # w3_ref: (H, d_out)   b3_ref: (1, d_out)
    # o_ref : (bm, d_out)

    z = z_ref[...]
    d_in = z.shape[1]

    # fc1: with d_in tiny (5), broadcast-FMAs on the VPU beat a K=5 MXU dot
    # (no MXU push/pop latency, no 5-lane LHS layout shuffle), and they are
    # exact f32.  Fall back to a dot if d_in is ever large.
    if d_in <= 16:
        h1 = z[:, 0:1] * w1_ref[0:1, :]
        for i in range(1, d_in):
            h1 = h1 + z[:, i:i + 1] * w1_ref[i:i + 1, :]
    else:
        h1 = jnp.dot(z, w1_ref[...], preferred_element_type=jnp.float32,
                     precision=lax.Precision.HIGHEST)
    h1 = jnp.tanh(h1 + b1_ref[...])

    # fc2 (MXU, f32-exact precision for parity with the PyTorch reference)
    h2 = jnp.dot(h1, w2_ref[...], preferred_element_type=jnp.float32,
                 precision=lax.Precision.HIGHEST) + b2_ref[...]
    h2 = jnp.tanh(h2)

    # fc3 -> narrow (bm, d_out) store; d_out is tiny so the masked store is cheap
    # and we avoid writing 64x padded zeros back to HBM.
    h3 = jnp.dot(h2, w3_ref[...], preferred_element_type=jnp.float32,
                 precision=lax.Precision.HIGHEST) + b3_ref[...]
    o_ref[...] = h3.astype(o_ref.dtype)


def mlp_2nd_order_forward(first_order_input, x_input, t, params, *, block_m=None):
    """Equivalent of MLP_2nd_order.forward(first_order_input, x_input, t)."""
    B, d = first_order_input.shape
    w1, b1, w2, b2, w3, b3 = (params["w1"], params["b1"], params["w2"],
                              params["b2"], params["w3"], params["b3"])
    d_in, H = w1.shape          # d_in = 2*d + 1
    d_out = w3.shape[1]

    # Pack the three inputs exactly like torch.cat([fo, x, t], dim=1).
    # One tiny HBM pass; gives a single tiled input DMA stream and 1/3 of the
    # lane-padded input VMEM inside the kernel.
    z = jnp.concatenate([first_order_input, x_input, t], axis=1)

    # Batch tiling: big tiles amortize the ~0.35 us per-grid-step overhead,
    # but keep >=2 grid steps for large batches (v7x megacore + DMA overlap).
    if block_m is None:
        block_m = min(2048, _round_up(B, 8))
        if B > 16:
            block_m = min(block_m, _round_up((B + 1) // 2, 8))
    block_m = max(8, _round_up(block_m, 8))

    Bp = _round_up(B, block_m)
    if Bp != B:
        z = jnp.pad(z, ((0, Bp - B), (0, 0)))

    grid = (Bp // block_m,)

    def tiled(shape):      # activations / output: march along the batch axis
        return pl.BlockSpec(shape, lambda i: (i, 0))

    def resident(shape):   # weights / biases: same block every step (stay in VMEM)
        return pl.BlockSpec(shape, lambda i: (0, 0))

    # --- VMEM budget: lane-padded (to 128) and double-buffered blocks + weights.
    lane = 128
    vmem_bytes = 4 * (
        2 * block_m * _round_up(d_in, lane)        # z (double-buffered)
        + 2 * block_m * _round_up(d_out, lane)     # output (double-buffered)
        + 2 * block_m * _round_up(H, lane)         # h1/h2 intermediates
        + _round_up(d_in, 8) * _round_up(H, lane)  # W1
        + _round_up(H, 8) * _round_up(H, lane)     # W2
        + _round_up(H, 8) * _round_up(d_out, lane) # W3
        + 3 * 8 * lane                             # biases
    )
    vmem_limit = min(max(2 * vmem_bytes, 32 << 20), 64 << 20)

    # --- Cost estimate (output no longer 128-padded).
    flops = 2 * Bp * (d_in * H + H * H + H * d_out)
    transcendentals = 2 * Bp * H
    bytes_accessed = 4 * (Bp * d_in + Bp * d_out
                          + d_in * H + H * H + H * d_out
                          + 2 * H + d_out)

    out = pl.pallas_call(
        mlp_2nd_order_kernel,
        out_shape=jax.ShapeDtypeStruct((Bp, d_out), jnp.float32),
        grid=grid,
        in_specs=[
            tiled((block_m, d_in)),    # packed [fo | x | t]
            resident((d_in, H)),       # W1
            resident((1, H)),          # b1
            resident((H, H)),          # W2
            resident((1, H)),          # b2
            resident((H, d_out)),      # W3
            resident((1, d_out)),      # b3
        ],
        out_specs=tiled((block_m, d_out)),
        compiler_params=pltpu.CompilerParams(
            dimension_semantics=("parallel",),
            vmem_limit_bytes=vmem_limit),
        cost_estimate=pl.CostEstimate(
            flops=flops,
            transcendentals=transcendentals,
            bytes_accessed=bytes_accessed),
    )(z, w1, b1, w2, b2, w3, b3)

    return out[:B, :]


def init_params(key, input_dim=2, hidden_num=32, dtype=jnp.float32):
    """Deterministic init mimicking PyTorch nn.Linear default:
    U(-1/sqrt(fan_in), 1/sqrt(fan_in)) for weights and biases.
    Weights stored as (in_features, out_features)."""
    d_in = input_dim + input_dim + 1
    keys = jax.random.split(key, 6)

    def linear(kw, kb, fan_in, fan_out):
        bound = 1.0 / jnp.sqrt(jnp.asarray(fan_in, dtype=jnp.float32))
        w = jax.random.uniform(kw, (fan_in, fan_out), dtype, -bound, bound)
        b = jax.random.uniform(kb, (1, fan_out), dtype, -bound, bound)
        return w, b

    w1, b1 = linear(keys[0], keys[1], d_in, hidden_num)
    w2, b2 = linear(keys[2], keys[3], hidden_num, hidden_num)
    w3, b3 = linear(keys[4], keys[5], hidden_num, input_dim)
    return {"w1": w1, "b1": b1, "w2": w2, "b2": b2, "w3": w3, "b3": b3}


def _reference(fo, xi, tt, p):
    z = jnp.concatenate([fo, xi, tt], axis=1)
    z = jnp.tanh(z @ p["w1"] + p["b1"])
    z = jnp.tanh(z @ p["w2"] + p["b2"])
    return z @ p["w3"] + p["b3"]


if __name__ == "__main__":
    key = jax.random.PRNGKey(0)
    k_params, k_fo, k_x, k_t = jax.random.split(key, 4)

    input_dim = 2
    hidden_num = 32

    params = init_params(k_params, input_dim=input_dim, hidden_num=hidden_num)

    # Case 1: batch that is a multiple of 8 (single tile).
    batch = 8
    first_order_input = jax.random.normal(k_fo, (batch, input_dim), jnp.float32)
    x_input = jax.random.normal(k_x, (batch, input_dim), jnp.float32)
    t = jax.random.uniform(k_t, (batch, 1), jnp.float32)

    out = mlp_2nd_order_forward(first_order_input, x_input, t, params)
    jax.block_until_ready(out)
    expected = _reference(first_order_input, x_input, t, params)
    assert out.shape == (batch, input_dim)
    assert jnp.allclose(out, expected, atol=2e-5, rtol=1e-5)

    # Case 2: ragged batch (exercises batch padding + slice-back path).
    batch2 = 13
    k_fo2, k_x2, k_t2 = jax.random.split(jax.random.PRNGKey(1), 3)
    fo2 = jax.random.normal(k_fo2, (batch2, input_dim), jnp.float32)
    xi2 = jax.random.normal(k_x2, (batch2, input_dim), jnp.float32)
    t2 = jax.random.uniform(k_t2, (batch2, 1), jnp.float32)

    out2 = mlp_2nd_order_forward(fo2, xi2, t2, params)
    jax.block_until_ready(out2)
    expected2 = _reference(fo2, xi2, t2, params)
    assert out2.shape == (batch2, input_dim)
    assert jnp.allclose(out2, expected2, atol=2e-5, rtol=1e-5)

    # Case 3: larger batch exercising the multi-step parallel grid.
    batch3 = 100
    k_fo3, k_x3, k_t3 = jax.random.split(jax.random.PRNGKey(2), 3)
    fo3 = jax.random.normal(k_fo3, (batch3, input_dim), jnp.float32)
    xi3 = jax.random.normal(k_x3, (batch3, input_dim), jnp.float32)
    t3 = jax.random.uniform(k_t3, (batch3, 1), jnp.float32)

    out3 = mlp_2nd_order_forward(fo3, xi3, t3, params)
    jax.block_until_ready(out3)
    expected3 = _reference(fo3, xi3, t3, params)
    assert out3.shape == (batch3, input_dim)
    assert jnp.allclose(out3, expected3, atol=2e-5, rtol=1e-5)

    print("KERNEL_OK")
</pallas_src>

<mosaic_0001>
module attributes {stable_mosaic.version = 11 : i64} {
  func.func @mlp_2nd_order_kernel(%arg0: i32, %arg1: memref<8x5xf32, #tpu.memory_space<vmem>>, %arg2: memref<5x32xf32, #tpu.memory_space<vmem>>, %arg3: memref<1x32xf32, #tpu.memory_space<vmem>>, %arg4: memref<32x32xf32, #tpu.memory_space<vmem>>, %arg5: memref<1x32xf32, #tpu.memory_space<vmem>>, %arg6: memref<32x2xf32, #tpu.memory_space<vmem>>, %arg7: memref<1x2xf32, #tpu.memory_space<vmem>>, %arg8: memref<8x2xf32, #tpu.memory_space<vmem>>) attributes {dimension_semantics = [#tpu.dimension_semantics<parallel>], iteration_bounds = array<i64: 1>, scalar_prefetch = 0 : i64, scratch_operands = 0 : i64, tpu.core_type = #tpu.core_type<tc>, window_params = [{transform_indices = @transform_0, window_bounds = array<i64: 8, 5>}, {pipeline_mode = #tpu.pipeline_mode<synchronous>, transform_indices = @transform_1, window_bounds = array<i64: 5, 32>}, {pipeline_mode = #tpu.pipeline_mode<synchronous>, transform_indices = @transform_2, window_bounds = array<i64: 1, 32>}, {pipeline_mode = #tpu.pipeline_mode<synchronous>, transform_indices = @transform_3, window_bounds = array<i64: 32, 32>}, {pipeline_mode = #tpu.pipeline_mode<synchronous>, transform_indices = @transform_4, window_bounds = array<i64: 1, 32>}, {pipeline_mode = #tpu.pipeline_mode<synchronous>, transform_indices = @transform_5, window_bounds = array<i64: 32, 2>}, {pipeline_mode = #tpu.pipeline_mode<synchronous>, transform_indices = @transform_6, window_bounds = array<i64: 1, 2>}, {transform_indices = @transform_7, window_bounds = array<i64: 8, 2>}]} {
    %c0 = arith.constant 0 : index
    %c0_0 = arith.constant 0 : index
    %0 = vector.load %arg1[%c0, %c0_0] : memref<8x5xf32, #tpu.memory_space<vmem>>, vector<8x5xf32>
    %1 = vector.extract_strided_slice %0 {offsets = [0, 0], sizes = [8, 1], strides = [1, 1]} : vector<8x5xf32> to vector<8x1xf32>
    %c0_1 = arith.constant 0 : index
    %c0_2 = arith.constant 0 : index
    %2 = vector.load %arg2[%c0_1, %c0_2] : memref<5x32xf32, #tpu.memory_space<vmem>>, vector<1x32xf32>
    %3 = vector.broadcast %1 : vector<8x1xf32> to vector<8x32xf32>
    %4 = vector.broadcast %2 : vector<1x32xf32> to vector<8x32xf32>
    %5 = arith.mulf %3, %4 : vector<8x32xf32>
    %6 = vector.extract_strided_slice %0 {offsets = [0, 1], sizes = [8, 1], strides = [1, 1]} : vector<8x5xf32> to vector<8x1xf32>
    %c1 = arith.constant 1 : index
    %c0_3 = arith.constant 0 : index
    %7 = vector.load %arg2[%c1, %c0_3] : memref<5x32xf32, #tpu.memory_space<vmem>>, vector<1x32xf32>
    %8 = vector.broadcast %6 : vector<8x1xf32> to vector<8x32xf32>
    %9 = vector.broadcast %7 : vector<1x32xf32> to vector<8x32xf32>
    %10 = arith.mulf %8, %9 : vector<8x32xf32>
    %11 = arith.addf %5, %10 : vector<8x32xf32>
    %12 = vector.extract_strided_slice %0 {offsets = [0, 2], sizes = [8, 1], strides = [1, 1]} : vector<8x5xf32> to vector<8x1xf32>
    %c2 = arith.constant 2 : index
    %c0_4 = arith.constant 0 : index
    %13 = vector.load %arg2[%c2, %c0_4] : memref<5x32xf32, #tpu.memory_space<vmem>>, vector<1x32xf32>
    %14 = vector.broadcast %12 : vector<8x1xf32> to vector<8x32xf32>
    %15 = vector.broadcast %13 : vector<1x32xf32> to vector<8x32xf32>
    %16 = arith.mulf %14, %15 : vector<8x32xf32>
    %17 = arith.addf %11, %16 : vector<8x32xf32>
    %18 = vector.extract_strided_slice %0 {offsets = [0, 3], sizes = [8, 1], strides = [1, 1]} : vector<8x5xf32> to vector<8x1xf32>
    %c3 = arith.constant 3 : index
    %c0_5 = arith.constant 0 : index
    %19 = vector.load %arg2[%c3, %c0_5] : memref<5x32xf32, #tpu.memory_space<vmem>>, vector<1x32xf32>
    %20 = vector.broadcast %18 : vector<8x1xf32> to vector<8x32xf32>
    %21 = vector.broadcast %19 : vector<1x32xf32> to vector<8x32xf32>
    %22 = arith.mulf %20, %21 : vector<8x32xf32>
    %23 = arith.addf %17, %22 : vector<8x32xf32>
    %24 = vector.extract_strided_slice %0 {offsets = [0, 4], sizes = [8, 1], strides = [1, 1]} : vector<8x5xf32> to vector<8x1xf32>
    %c4 = arith.constant 4 : index
    %c0_6 = arith.constant 0 : index
    %25 = vector.load %arg2[%c4, %c0_6] : memref<5x32xf32, #tpu.memory_space<vmem>>, vector<1x32xf32>
    %26 = vector.broadcast %24 : vector<8x1xf32> to vector<8x32xf32>
    %27 = vector.broadcast %25 : vector<1x32xf32> to vector<8x32xf32>
    %28 = arith.mulf %26, %27 : vector<8x32xf32>
    %29 = arith.addf %23, %28 : vector<8x32xf32>
    %c0_7 = arith.constant 0 : index
    %c0_8 = arith.constant 0 : index
    %30 = vector.load %arg3[%c0_7, %c0_8] : memref<1x32xf32, #tpu.memory_space<vmem>>, vector<1x32xf32>
    %31 = vector.broadcast %30 : vector<1x32xf32> to vector<8x32xf32>
    %32 = arith.addf %29, %31 : vector<8x32xf32>
    %33 = math.tanh %32 : vector<8x32xf32>
    %c0_9 = arith.constant 0 : index
    %c0_10 = arith.constant 0 : index
    %34 = vector.load %arg4[%c0_9, %c0_10] : memref<32x32xf32, #tpu.memory_space<vmem>>, vector<32x32xf32>
    %cst = arith.constant dense<0.000000e+00> : vector<8x32xf32>
    %35 = tpu.matmul %33, %34, %cst {dimension_numbers = #tpu.dot_dimension_numbers<[1], [0], [0], [1], [0, 0, 1, 1], [], []>, precision = #tpu.contract_precision<fp32>} : vector<8x32xf32>, vector<32x32xf32>, vector<8x32xf32> -> vector<8x32xf32>
    %c0_11 = arith.constant 0 : index
    %c0_12 = arith.constant 0 : index
    %36 = vector.load %arg5[%c0_11, %c0_12] : memref<1x32xf32, #tpu.memory_space<vmem>>, vector<1x32xf32>
    %37 = vector.broadcast %36 : vector<1x32xf32> to vector<8x32xf32>
    %38 = arith.addf %35, %37 : vector<8x32xf32>
    %39 = math.tanh %38 : vector<8x32xf32>
    %c0_13 = arith.constant 0 : index
    %c0_14 = arith.constant 0 : index
    %40 = vector.load %arg6[%c0_13, %c0_14] : memref<32x2xf32, #tpu.memory_space<vmem>>, vector<32x2xf32>
    %cst_15 = arith.constant dense<0.000000e+00> : vector<8x2xf32>
    %41 = tpu.matmul %39, %40, %cst_15 {dimension_numbers = #tpu.dot_dimension_numbers<[1], [0], [0], [1], [0, 0, 1, 1], [], []>, precision = #tpu.contract_precision<fp32>} : vector<8x32xf32>, vector<32x2xf32>, vector<8x2xf32> -> vector<8x2xf32>
    %c0_16 = arith.constant 0 : index
    %c0_17 = arith.constant 0 : index
    %42 = vector.load %arg7[%c0_16, %c0_17] : memref<1x2xf32, #tpu.memory_space<vmem>>, vector<1x2xf32>
    %43 = vector.broadcast %42 : vector<1x2xf32> to vector<8x2xf32>
    %44 = arith.addf %41, %43 : vector<8x2xf32>
    %c0_18 = arith.constant 0 : index
    %c0_19 = arith.constant 0 : index
    %45 = vector.load %arg8[%c0_18, %c0_19] : memref<8x2xf32, #tpu.memory_space<vmem>>, vector<8x2xf32>
    tpu.vector_store %arg8[%c0_18, %c0_19], %44 {strides = array<i32>} : memref<8x2xf32, #tpu.memory_space<vmem>>, vector<8x2xf32>,
    return
  }
  func.func @transform_0(%arg0: i32) -> (i32, i32) {
    %c0_i32 = arith.constant 0 : i32
    %c0_i32_0 = arith.constant 0 : i32
    return %arg0, %c0_i32 : i32, i32
  }
  func.func @transform_1(%arg0: i32) -> (i32, i32) {
    %c0_i32 = arith.constant 0 : i32
    %c0_i32_0 = arith.constant 0 : i32
    %c0_i32_1 = arith.constant 0 : i32
    return %c0_i32, %c0_i32_0 : i32, i32
  }
  func.func @transform_2(%arg0: i32) -> (i32, i32) {
    %c0_i32 = arith.constant 0 : i32
    %c0_i32_0 = arith.constant 0 : i32
    %c0_i32_1 = arith.constant 0 : i32
    return %c0_i32, %c0_i32_0 : i32, i32
  }
  func.func @transform_3(%arg0: i32) -> (i32, i32) {
    %c0_i32 = arith.constant 0 : i32
    %c0_i32_0 = arith.constant 0 : i32
    %c0_i32_1 = arith.constant 0 : i32
    return %c0_i32, %c0_i32_0 : i32, i32
  }
  func.func @transform_4(%arg0: i32) -> (i32, i32) {
    %c0_i32 = arith.constant 0 : i32
    %c0_i32_0 = arith.constant 0 : i32
    %c0_i32_1 = arith.constant 0 : i32
    return %c0_i32, %c0_i32_0 : i32, i32
  }
  func.func @transform_5(%arg0: i32) -> (i32, i32) {
    %c0_i32 = arith.constant 0 : i32
    %c0_i32_0 = arith.constant 0 : i32
    %c0_i32_1 = arith.constant 0 : i32
    return %c0_i32, %c0_i32_0 : i32, i32
  }
  func.func @transform_6(%arg0: i32) -> (i32, i32) {
    %c0_i32 = arith.constant 0 : i32
    %c0_i32_0 = arith.constant 0 : i32
    %c0_i32_1 = arith.constant 0 : i32
    return %c0_i32, %c0_i32_0 : i32, i32
  }
  func.func @transform_7(%arg0: i32) -> (i32, i32) {
    %c0_i32 = arith.constant 0 : i32
    %c0_i32_0 = arith.constant 0 : i32
    return %arg0, %c0_i32 : i32, i32
  }
}

</mosaic_0001>

<bundles_post_ra>
// kernel: tpu_custom_call.1
= control target key start
LH: loop header
LB: loop body
LE: loop exit
PB: predicated region body
PF: predicated region fallthrough
CT: control target
= control target key end

     0   :  { %12 = vsyncpa [#allocation3], 0  ;;  %s671_s0 = inlined_call_operand.hbm [shape: f32[8,5], index: 0, kind: input, shape index: {}]   ;;  %s672_s1 = inlined_call_operand.hbm [shape: f32[5,32], index: 1, kind: input, shape index: {}]   ;;  %s673_s2 = inlined_call_operand.vmem [shape: f32[1,32], index: 2, kind: input, shape index: {}]   ;;  %s674_s3 = inlined_call_operand.vmem [shape: f32[32,32], index: 3, kind: input, shape index: {}]   ;;  %s675_s4 = inlined_call_operand.vmem [shape: f32[1,32], index: 4, kind: input, shape index: {}]   ;;  %s676_s5 = inlined_call_operand.vmem [shape: f32[32,2], index: 5, kind: input, shape index: {}]   ;;  %s677_s6 = inlined_call_operand.vmem [shape: f32[1,2], index: 6, kind: input, shape index: {}]   ;;  %s678_s7 = inlined_call_operand.vmem [shape: f32[8,2], index: 7, kind: output, shape index: {}]  }
   0x1   :  { %s19_s26 = sshll.u32 %s671_s0, 4  ;;  %s20_s26 = int_to_ptr.hbm [resolvable:$true] %s19_s26 }
   0x2   :  { %13 = vsyncpa [#allocation5], 0  ;;  %s580_s27 = smov [#allocation2]   ;;  %s30_s8 = sshll.u32 %s672_s1, 4  ;;  %s31_s8 = int_to_ptr.hbm [resolvable:$true] %s30_s8 }
   0x3   :  { %s21_s28 = sshll.u32 %s580_s27, 4  ;;  %s581_s9 = smov [#allocation4]   ;;  %s22_s28 = int_to_ptr.vmem [resolvable:$true] %s21_s28 }
   0x4   :  { %24 = dma.hbm_to_vmem [thread:$0]  %s20_s26, 128, %s22_s28, [#allocation3]  }
   0x5   :  { %s32_s10 = sshll.u32 %s581_s9, 4  ;;  %s33_s10 = int_to_ptr.vmem [resolvable:$true] %s32_s10 }
   0x6   :  { %35 = dma.hbm_to_vmem [thread:$0]  %s31_s8, 128, %s33_s10, [#allocation5]  }
   0x7   :  { %576 = dma.done.wait [#allocation3], 128  }
   0x8   :  { %577 = vsyncadd [#allocation3], 4294967168 }
   0x9   :  { %578 = dma.done.wait [#allocation5], 128  }
   0xa   :  { %579 = vsyncadd [#allocation5], 4294967168  ;;  %v582_v0 = vmov 0   ;;  %v583_v1 = vmov 2   ;;  %v584_v2 = vmov 4   ;;  %v54_v3 = vld [vmem:[#allocation2] sm:$0xff] }
   0xb   :  { %510 = vset.pattern.permute.xlu0 %v582_v0  ;;  %512 = vset.pattern.permute.xlu1 %v583_v1  ;;  %v585_v4 = vmov 1   ;;  %v586_v5 = vmov 3   ;;  %v104_v6 = vld [vmem:[%s674_s3 + $0x18] sm:$0xff]  ;;  %v103_v8 = vld [vmem:[%s674_s3 + $0x10] sm:$0xff]  ;;  %v102_v11 = vld [vmem:[%s674_s3 + $0x8] sm:$0xff]  ;;  %vm109_vm0 = vcmask 261120  }
   0xc   :  { %514 = vset.pattern.permute.xlu2 %v584_v2  ;;  %58 = vperm.xlu0 %510, %v54_v3   ;;  %v125_v7 = vand.u32 4294901760, %v104_v6  ;;  %v127_v10 = vand.u32 4294901760, %v103_v8  ;;  %v129_v14 = vand.u32 4294901760, %v102_v11  ;;  %v101_v15 = vld [vmem:[%s674_s3] sm:$0xff]  ;;  %v516_v32 = vld [vmem:[#allocation4] ss:$0 sm:$0xff] }
   0xd   :  { %73 = vperm.xlu1 %512, %v54_v3   ;;  %89 = vperm.xlu2 %514, %v54_v3   ;;  %v131_v19 = vand.u32 4294901760, %v101_v15  ;;  %v518_v33 = vld [vmem:[#allocation4 + $0x1] ss:$0 sm:$0xff]  ;;  %v517_v34 = vld [vmem:[#allocation4 + $0x2] ss:$0 sm:$0xff]  ;;  %v302_v58 = vld [vmem:[%s676_s5 + $0x18] sm:$0xff] }
   0xe   :  { %v155_v9 = vsub.f32 %v104_v6, %v125_v7  ;;  %226 = vmatpush.msra.mxu3 %v125_v7  ;;  %126 = vmatpush.msra.mxu0 %v125_v7  ;;  %v161_v13 = vsub.f32 %v103_v8, %v127_v10  ;;  %v167_v18 = vsub.f32 %v102_v11, %v129_v14  ;;  %v519_v35 = vld [vmem:[#allocation4 + $0x3] ss:$0 sm:$0xff]  ;;  %v520_v40 = vld [vmem:[#allocation4 + $0x4] ss:$0 sm:$0xff]  ;;  %v521_v48 = vld [vmem:[%s673_s2] ss:$0 sm:$0xff] }
   0xf   :  { %v173_v23 = vsub.f32 %v101_v15, %v131_v19  ;;  %v322_v59 = vand.u32 4294901760, %v302_v58  ;;  %v301_v60 = vld [vmem:[%s676_s5 + $0x10] sm:$0xff]  ;;  %v300_v63 = vld [vmem:[%s676_s5 + $0x8] sm:$0xff]  ;;  %vm495_vm1 = vcmask 15360  }
  0x10   :  { %v156_v12 = vand.u32 4294901760, %v155_v9  ;;  %197 = vmatpush.msra.mxu2 %v155_v9  ;;  %228 = vmatpush.msra.mxu3 %v127_v10  ;;  %v162_v17 = vand.u32 4294901760, %v161_v13  ;;  %v168_v22 = vand.u32 4294901760, %v167_v18  ;;  %v324_v62 = vand.u32 4294901760, %v301_v60 }
  0x11   :  { %128 = vmatpush.msra.mxu0 %v127_v10  ;;  %v174_v26 = vand.u32 4294901760, %v173_v23  ;;  %v352_v61 = vsub.f32 %v302_v58, %v322_v59 }
  0x12   :  { %v157_v16 = vsub.f32 %v155_v9, %v156_v12  ;;  %200 = vmatpush.msra.mxu2 %v161_v13  ;;  %230 = vmatpush.msra.mxu3 %v129_v14  ;;  %v163_v21 = vsub.f32 %v161_v13, %v162_v17  ;;  %v169_v25 = vsub.f32 %v167_v18, %v168_v22 }
  0x13   :  { %130 = vmatpush.msra.mxu0 %v129_v14  ;;  %v175_v28 = vsub.f32 %v173_v23, %v174_v26  ;;  %v353_v0 = vand.u32 4294901760, %v352_v61  ;;  %v358_v1 = vsub.f32 %v301_v60, %v324_v62 }
  0x14   :  { %511 = vset.pattern.permute.xlu0 %v585_v4  ;;  %v158_v20 = vand.u32 4294901760, %v157_v16  ;;  %203 = vmatpush.msra.mxu2 %v167_v18  ;;  %v164_v24 = vand.u32 4294901760, %v163_v21  ;;  %v170_v27 = vand.u32 4294901760, %v169_v25  ;;  %v522_v18 = vld [vmem:[%s675_s4] ss:$0 sm:$0xff] }
  0x15   :  { %513 = vset.pattern.permute.xlu1 %v586_v5  ;;  %65 = vperm.xlu0 %511, %v54_v3   ;;  %v176_v29 = vand.u32 4294901760, %v175_v28  ;;  %v354_v4 = vsub.f32 %v352_v61, %v353_v0  ;;  %v359_v5 = vand.u32 4294901760, %v358_v1 }
  0x16   :  { %81 = vperm.xlu1 %513, %v54_v3   ;;  %232 = vmatpush.msra.mxu3 %v131_v19  ;;  %v299_v3 = vld [vmem:[%s676_s5] sm:$0xff] }
  0x17   :  { %132 = vmatpush.msra.mxu0 %v131_v19  ;;  %159 = vmatpush.msra.mxu1 %v158_v20  ;;  %v355_v8 = vand.u32 4294901760, %v354_v4  ;;  %v360_v9 = vsub.f32 %v358_v1, %v359_v5 }
  0x18   :  { %206 = vmatpush.msra.mxu2 %v173_v23 }
  0x19   :  { %255 = vmatpush.msrb.mxu0 %v156_v12  ;;  %165 = vmatpush.msra.mxu1 %v164_v24  ;;  %v361_v12 = vand.u32 4294901760, %v360_v9 }
  0x1a   :  { %323 = vmatpush.msrb.mxu2 %v322_v59  ;;  %356 = vmatpush.msrb.mxu3 %v355_v8 }
  0x1b   :  { %259 = vmatpush.msrb.mxu0 %v162_v17  ;;  %171 = vmatpush.msra.mxu1 %v170_v27 }
  0x1c   :  { %325 = vmatpush.msrb.mxu2 %v324_v62  ;;  %362 = vmatpush.msrb.mxu3 %v361_v12 }
  0x1d   :  { %515 = vset.pattern.permute.xlu0 %v584_v2  ;;  %263 = vmatpush.msrb.mxu0 %v168_v22  ;;  %v326_v2 = vand.u32 4294901760, %v300_v63 }
  0x1e   :  { %177 = vmatpush.msra.mxu1 %v176_v29 }
  0x1f   :  { %267 = vmatpush.msrb.mxu0 %v174_v26  ;;  %v364_v6 = vsub.f32 %v300_v63, %v326_v2  ;;  %327 = vmatpush.msrb.mxu2 %v326_v2 }
  0x20   :  { %286 = vmatpush.msrb.mxu1 %v125_v7  ;;  %v328_v7 = vand.u32 4294901760, %v299_v3 }
  0x22   :  { %288 = vmatpush.msrb.mxu1 %v127_v10  ;;  %v365_v10 = vand.u32 4294901760, %v364_v6  ;;  %v370_v11 = vsub.f32 %v299_v3, %v328_v7  ;;  %329 = vmatpush.msrb.mxu2 %v328_v7 }
  0x24   :  { %290 = vmatpush.msrb.mxu1 %v129_v14  ;;  %v366_v13 = vsub.f32 %v364_v6, %v365_v10  ;;  %v371_v14 = vand.u32 4294901760, %v370_v11 }
  0x26   :  { %292 = vmatpush.msrb.mxu1 %v131_v19  ;;  %v367_v15 = vand.u32 4294901760, %v366_v13  ;;  %v372_v16 = vsub.f32 %v370_v11, %v371_v14 }
  0x28   :  { %368 = vmatpush.msrb.mxu3 %v367_v15  ;;  %v373_v17 = vand.u32 4294901760, %v372_v16 }
  0x2a   :  { %374 = vmatpush.msrb.mxu3 %v373_v17 }
  0x67   :  { %v90_v41 = vpop.permute.xlu2 %89 }
  0x68   :  { %v93_v46 = vmul.f32 %v520_v40, %v90_v41 }
  0x7e   :  { %v59_v30 = vpop.permute.xlu0 %58 }
  0x7f   :  { %v74_v31 = vpop.permute.xlu1 %73  ;;  %v62_v38 = vmul.f32 %v516_v32, %v59_v30 }
  0x80   :  { %v77_v42 = vmul.f32 %v517_v34, %v74_v31 }
  0x87   :  { %v66_v36 = vpop.permute.xlu0 %65 }
  0x88   :  { %v82_v37 = vpop.permute.xlu1 %81  ;;  %v69_v39 = vmul.f32 %v518_v33, %v66_v36 }
  0x89   :  { %v85_v44 = vmul.f32 %v519_v35, %v82_v37 }
  0x8a   :  { %v70_v43 = vadd.f32 %v69_v39, %v62_v38  ;;  %v523_v38 = vld [vmem:[%s677_s6] ss:$0 sm:$0xff] }
  0x8c   :  { %v78_v45 = vadd.f32 %v77_v42, %v70_v43 }
  0x8e   :  { %v86_v47 = vadd.f32 %v85_v44, %v78_v45 }
  0x90   :  { %v94_v49 = vadd.f32 %v93_v46, %v86_v47 }
  0x92   :  { %v99_v50 = vadd.f32 %v521_v48, %v94_v49 }
  0x94   :  { %524 = vtanh.f32 %v99_v50 }
  0x9a   :  { %v525_v51 = vpop.eup %524 }
  0x9b   :  { %v111_v52 = vsel %vm109_vm0, %v525_v51, 0 }
  0x9c   :  { %v133_v53 = vand.u32 4294901760, %v111_v52 }
  0x9e   :  { %179 = vmatmul.f32.vlgmr.msra.gmra.mxu1 %v133_v53  ;;  %v134_v54 = vsub.f32 %v111_v52, %v133_v53 }
  0x9f   :  { %423 = vmatpush.msra.mxu1 %v322_v59 }
  0xa0   :  { %209 = vmatmul.f32.vlgmr.msra.gmra.mxu2 %v134_v54  ;;  %v135_v55 = vand.u32 4294901760, %v134_v54 }
  0xa1   :  { %425 = vmatpush.msra.mxu1 %v324_v62  ;;  %452 = vmatpush.msra.mxu2 %v353_v0 }
  0xa2   :  { %236 = vmatmul.f32.vlgmr.msra.gmra.mxu3 %v135_v55  ;;  %v136_v56 = vsub.f32 %v134_v54, %v135_v55 }
  0xa3   :  { %427 = vmatpush.msra.mxu1 %v326_v2  ;;  %456 = vmatpush.msra.mxu2 %v359_v5 }
  0xa4   :  { %v137_v57 = vand.u32 4294901760, %v136_v56  ;;  %483 = vmatpush.msra.mxu3 %v322_v59 }
  0xa5   :  { %429 = vmatpush.msra.mxu1 %v328_v7  ;;  %460 = vmatpush.msra.mxu2 %v365_v10 }
  0xa6   :  { %138 = vmatmul.f32.vlgmr.msra.gmra.mxu0 %v137_v57  ;;  %294 = vmatmul.f32.vlgmr.msrb.gmra.mxu1 %v133_v53 }
  0xa7   :  { %394 = vmatpush.msra.mxu0 %v352_v61  ;;  %464 = vmatpush.msra.mxu2 %v371_v14 }
  0xa8   :  { %485 = vmatpush.msra.mxu3 %v324_v62 }
  0xa9   :  { %397 = vmatpush.msra.mxu0 %v358_v1 }
  0xaa   :  { %487 = vmatpush.msra.mxu3 %v326_v2 }
  0xab   :  { %400 = vmatpush.msra.mxu0 %v364_v6 }
  0xac   :  { %489 = vmatpush.msra.mxu3 %v328_v7 }
  0xad   :  { %403 = vmatpush.msra.mxu0 %v370_v11 }
  0xae   :  { %269 = vmatmul.f32.vlgmr.msrb.gmra.mxu0 %v133_v53 }
 0x11b   :  { %v180_v19 = vpop.f32.mrf.mxu1 }
 0x123   :  { %v139_v20 = vpop.f32.mrf.mxu0  ;;  %v210_v23 = vpop.f32.mrf.mxu2 }
 0x124   :  { %v140_v21 = vadd.f32 %v522_v18, %v139_v20  ;;  %v295_v29 = vpop.f32.mrf.mxu1 }
 0x125   :  { %v237_v25 = vpop.f32.mrf.mxu3 }
 0x126   :  { %v181_v22 = vadd.f32 %v180_v19, %v140_v21 }
 0x128   :  { %v211_v24 = vadd.f32 %v210_v23, %v181_v22 }
 0x12a   :  { %v238_v26 = vadd.f32 %v237_v25, %v211_v24 }
 0x12b   :  { %v270_v27 = vpop.f32.mrf.mxu0 }
 0x12c   :  { %v271_v28 = vadd.f32 %v270_v27, %v238_v26 }
 0x12e   :  { %v296_v30 = vadd.f32 %v295_v29, %v271_v28 }
 0x130   :  { %526 = vtanh.f32 %v296_v30 }
 0x136   :  { %v527_v31 = vpop.eup %526 }
 0x137   :  { %v308_v32 = vsel %vm109_vm0, %v527_v31, 0 }
 0x138   :  { %v330_v33 = vand.u32 4294901760, %v308_v32 }
 0x13a   :  { %376 = vmatmul.f32.vlgmr.msrb.gmra.mxu3 %v330_v33  ;;  %v331_v34 = vsub.f32 %v308_v32, %v330_v33 }
 0x13c   :  { %406 = vmatmul.f32.vlgmr.msra.gmra.mxu0 %v331_v34  ;;  %v332_v35 = vand.u32 4294901760, %v331_v34 }
 0x13e   :  { %433 = vmatmul.f32.vlgmr.msra.gmra.mxu1 %v332_v35  ;;  %v333_v36 = vsub.f32 %v331_v34, %v332_v35 }
 0x140   :  { %v334_v37 = vand.u32 4294901760, %v333_v36 }
 0x142   :  { %335 = vmatmul.f32.vlgmr.msrb.gmra.mxu2 %v334_v37  ;;  %491 = vmatmul.f32.vlgmr.msra.gmra.mxu3 %v330_v33 }
 0x14a   :  { %466 = vmatmul.f32.vlgmr.msra.gmra.mxu2 %v330_v33 }
 0x1b9   :  { %v407_v43 = vpop.f32.mrf.mxu0 }
 0x1bb   :  { %v434_v45 = vpop.f32.mrf.mxu1 }
 0x1bd   :  { %v377_v39 = vpop.f32.mrf.mxu3 }
 0x1c5   :  { %v336_v40 = vpop.f32.mrf.mxu2  ;;  %v492_v49 = vpop.f32.mrf.mxu3 }
 0x1c6   :  { %v337_v41 = vadd.f32 %v523_v38, %v336_v40 }
 0x1c8   :  { %v378_v42 = vadd.f32 %v377_v39, %v337_v41 }
 0x1ca   :  { %v408_v44 = vadd.f32 %v407_v43, %v378_v42 }
 0x1cc   :  { %v435_v46 = vadd.f32 %v434_v45, %v408_v44 }
 0x1cd   :  { %v467_v47 = vpop.f32.mrf.mxu2 }
 0x1ce   :  { %v468_v48 = vadd.f32 %v467_v47, %v435_v46 }
 0x1d0   :  { %v493_v50 = vadd.f32 %v492_v49, %v468_v48 }
 0x1d2   :  { %496 = vst.msk [vmem:[%s678_s7] sm:$0xff] %vm495_vm1, %v493_v50 }
 0x1d3   :  { %501 = vsyncpa [#allocation3], 1 }
 0x1d4   :  { %502 = vsyncpa [#allocation5], 1 }

</bundles_post_ra>
